<compile_context>
chip_gen: v5e
topology: v5e:2x2
jax: 0.10.0
libtpu: 0.0.40
codegen_flags: <defaults>
</compile_context>

<pallas_src>
import functools

import jax
import jax.numpy as jnp
from jax.experimental import pallas as pl
from jax.experimental.pallas import tpu as pltpu


def _focal_loss_kernel(pred_ref, label_ref, out_ref, *, gamma, alpha,
                       n_rows, row_tile, apply_mask):
    x = pred_ref[...].astype(jnp.float32)   # logits tile (row_tile, C)
    z = label_ref[...].astype(jnp.float32)  # labels tile (row_tile, C)

    # One exp per element, reused by both BCE and sigmoid.
    e = jnp.exp(-jnp.abs(x))

    # Numerically stable binary_cross_entropy_with_logits, reduction='none':
    #   max(x, 0) - x*z + log(1 + exp(-|x|))
    bce = jnp.maximum(x, 0.0) - x * z + jnp.log1p(e)

    # sigmoid(x):  s = 1/(1+exp(-|x|)) = sigmoid(|x|);  sigmoid(x) = s if x>=0 else 1-s
    s = 1.0 / (1.0 + e)
    p = jnp.where(x >= 0.0, s, 1.0 - s)

    # p_t = label * p + (1 - label) * (1 - p)
    p_t = z * p + (1.0 - z) * (1.0 - p)
    t = 1.0 - p_t

    # modulating_factor = (1 - p_t) ** gamma   (cheap special cases, no exp/log pow)
    g = float(gamma)
    if g == 0.0:
        mod = jnp.ones_like(t)
    elif g == 1.0:
        mod = t
    elif g == 1.5:
        mod = t * jnp.sqrt(t)          # t >= 0, sqrt is a single EUP op
    elif g == 2.0:
        mod = t * t
    else:
        mod = jnp.power(t, jnp.float32(g))
    loss = bce * mod

    # alpha_factor (alpha > 0 branch)
    if alpha > 0:
        loss = loss * (z * alpha + (1.0 - z) * (1.0 - alpha))

    if apply_mask:
        # Zero out rows of the (padded) boundary block that lie past n_rows.
        row0 = pl.program_id(0) * row_tile
        ridx = jax.lax.broadcasted_iota(jnp.int32, loss.shape, 0)
        loss = jnp.where(row0 + ridx < n_rows, loss, 0.0)

    # Per-tile partial sum (divide by C and sum across tiles happen outside).
    out_ref[0, 0] = jnp.sum(loss)


def focal_loss_pallas(pred, label, gamma=1.5, alpha=0.25, row_tile=None):
    """Pallas implementation of ultralytics FocalLoss.forward (scalar output)."""
    assert pred.shape == label.shape and pred.ndim == 2
    n_rows, n_cols = pred.shape

    if row_tile is None:
        # ~2 MiB per f32 input block -> 2 inputs x 2 pipeline buffers = 8 MiB VMEM,
        # safe under default scoped VMEM on v5e/v6e/v7x.  Cap at 1024 rows and at
        # the (8-rounded) row count of the array itself.
        target_bytes = 2 * 1024 * 1024
        rt = max(8, target_bytes // (max(n_cols, 1) * 4))
        rt = min(rt, 1024)
        rt = max(8, (rt // 8) * 8)
        rt = min(rt, max(8, ((n_rows + 7) // 8) * 8))
        row_tile = rt
    assert row_tile % 8 == 0

    num_tiles = pl.cdiv(n_rows, row_tile)
    apply_mask = (n_rows % row_tile) != 0

    kernel = functools.partial(
        _focal_loss_kernel,
        gamma=float(gamma),
        alpha=float(alpha),
        n_rows=n_rows,
        row_tile=row_tile,
        apply_mask=apply_mask,
    )

    partials = pl.pallas_call(
        kernel,
        out_shape=jax.ShapeDtypeStruct((num_tiles, 1), jnp.float32),
        grid_spec=pltpu.PrefetchScalarGridSpec(
            num_scalar_prefetch=0,
            grid=(num_tiles,),
            in_specs=[
                pl.BlockSpec((row_tile, n_cols), lambda i: (i, 0)),
                pl.BlockSpec((row_tile, n_cols), lambda i: (i, 0)),
            ],
            out_specs=pl.BlockSpec(
                (1, 1), lambda i: (i, 0), memory_space=pltpu.SMEM
            ),
        ),
        compiler_params=pltpu.CompilerParams(
            # Independent per-tile partials: grid axis is parallel (megacore on v7x).
            dimension_semantics=("parallel",),
        ),
    )(pred, label)

    # loss.mean(1).sum() == sum(loss) / C
    return jnp.sum(partials) / jnp.float32(n_cols)


def focal_loss_ref(pred, label, gamma=1.5, alpha=0.25):
    """Pure-JAX reference mirroring the PyTorch module exactly."""
    pred = pred.astype(jnp.float32)
    label = label.astype(jnp.float32)
    bce = jnp.maximum(pred, 0.0) - pred * label + jnp.log1p(jnp.exp(-jnp.abs(pred)))
    p = jax.nn.sigmoid(pred)
    p_t = label * p + (1 - label) * (1 - p)
    loss = bce * (1.0 - p_t) ** gamma
    if alpha > 0:
        loss = loss * (label * alpha + (1 - label) * (1 - alpha))
    return loss.mean(1).sum()


if __name__ == "__main__":
    # FocalLoss has no parameters; build deterministic example inputs.
    key = jax.random.PRNGKey(0)

    # Case 1: nicely shaped (anchors, classes)-like input.
    k1, k2, k3, k4 = jax.random.split(key, 4)
    N1, C1 = 16, 128
    pred1 = jax.random.normal(k1, (N1, C1), dtype=jnp.float32) * 2.0
    label1 = (jax.random.uniform(k2, (N1, C1)) > 0.9).astype(jnp.float32)
    out1 = jax.block_until_ready(focal_loss_pallas(pred1, label1, gamma=1.5, alpha=0.25))
    ref1 = focal_loss_ref(pred1, label1, gamma=1.5, alpha=0.25)
    assert jnp.allclose(out1, ref1, rtol=1e-5, atol=1e-5), (out1, ref1)

    # Case 2: ragged row count + YOLO-like class count (exercises the mask path).
    N2, C2 = 21, 80
    pred2 = jax.random.normal(k3, (N2, C2), dtype=jnp.float32) * 2.0
    label2 = (jax.random.uniform(k4, (N2, C2)) > 0.9).astype(jnp.float32)
    out2 = jax.block_until_ready(focal_loss_pallas(pred2, label2, gamma=1.5, alpha=0.25))
    ref2 = focal_loss_ref(pred2, label2, gamma=1.5, alpha=0.25)
    assert jnp.allclose(out2, ref2, rtol=1e-5, atol=1e-5), (out2, ref2)

    print("KERNEL_OK")
</pallas_src>

<mosaic_0001>
module attributes {stable_mosaic.version = 11 : i64} {
  func.func @_focal_loss_kernel(%arg0: i32, %arg1: memref<16x128xf32, #tpu.memory_space<vmem>>, %arg2: memref<16x128xf32, #tpu.memory_space<vmem>>, %arg3: memref<1x1xf32, #tpu.memory_space<smem>>) attributes {dimension_semantics = [#tpu.dimension_semantics<parallel>], iteration_bounds = array<i64: 1>, scalar_prefetch = 0 : i64, scratch_operands = 0 : i64, tpu.core_type = #tpu.core_type<tc>, window_params = [{transform_indices = @transform_0, window_bounds = array<i64: 16, 128>}, {transform_indices = @transform_1, window_bounds = array<i64: 16, 128>}, {transform_indices = @transform_2, window_bounds = array<i64: 1, 1>}]} {
    %c0 = arith.constant 0 : index
    %c0_0 = arith.constant 0 : index
    %0 = vector.load %arg1[%c0, %c0_0] : memref<16x128xf32, #tpu.memory_space<vmem>>, vector<16x128xf32>
    %c0_1 = arith.constant 0 : index
    %c0_2 = arith.constant 0 : index
    %1 = vector.load %arg2[%c0_1, %c0_2] : memref<16x128xf32, #tpu.memory_space<vmem>>, vector<16x128xf32>
    %2 = math.absf %0 : vector<16x128xf32>
    %cst = arith.constant 0.000000e+00 : f32
    %3 = vector.broadcast %cst : f32 to vector<16x128xf32>
    %4 = arith.subf %3, %2 : vector<16x128xf32>
    %5 = math.exp %4 : vector<16x128xf32>
    %cst_3 = arith.constant 0.000000e+00 : f32
    %6 = vector.broadcast %cst_3 : f32 to vector<16x128xf32>
    %7 = arith.maximumf %0, %6 : vector<16x128xf32>
    %8 = arith.mulf %0, %1 : vector<16x128xf32>
    %9 = arith.subf %7, %8 : vector<16x128xf32>
    %10 = math.log1p %5 : vector<16x128xf32>
    %11 = arith.addf %9, %10 : vector<16x128xf32>
    %cst_4 = arith.constant 1.000000e+00 : f32
    %12 = vector.broadcast %cst_4 : f32 to vector<16x128xf32>
    %13 = arith.addf %12, %5 : vector<16x128xf32>
    %cst_5 = arith.constant 1.000000e+00 : f32
    %14 = vector.broadcast %cst_5 : f32 to vector<16x128xf32>
    %15 = arith.divf %14, %13 : vector<16x128xf32>
    %cst_6 = arith.constant 0.000000e+00 : f32
    %16 = vector.broadcast %cst_6 : f32 to vector<16x128xf32>
    %17 = arith.cmpf oge, %0, %16 : vector<16x128xf32>
    %cst_7 = arith.constant 1.000000e+00 : f32
    %18 = vector.broadcast %cst_7 : f32 to vector<16x128xf32>
    %19 = arith.subf %18, %15 : vector<16x128xf32>
    %20 = arith.select %17, %15, %19 : vector<16x128xi1>, vector<16x128xf32>
    %21 = arith.mulf %1, %20 : vector<16x128xf32>
    %cst_8 = arith.constant 1.000000e+00 : f32
    %22 = vector.broadcast %cst_8 : f32 to vector<16x128xf32>
    %23 = arith.subf %22, %1 : vector<16x128xf32>
    %cst_9 = arith.constant 1.000000e+00 : f32
    %24 = vector.broadcast %cst_9 : f32 to vector<16x128xf32>
    %25 = arith.subf %24, %20 : vector<16x128xf32>
    %26 = arith.mulf %23, %25 : vector<16x128xf32>
    %27 = arith.addf %21, %26 : vector<16x128xf32>
    %cst_10 = arith.constant 1.000000e+00 : f32
    %28 = vector.broadcast %cst_10 : f32 to vector<16x128xf32>
    %29 = arith.subf %28, %27 : vector<16x128xf32>
    %30 = math.sqrt %29 : vector<16x128xf32>
    %31 = arith.mulf %29, %30 : vector<16x128xf32>
    %32 = arith.mulf %11, %31 : vector<16x128xf32>
    %cst_11 = arith.constant 2.500000e-01 : f32
    %33 = vector.broadcast %cst_11 : f32 to vector<16x128xf32>
    %34 = arith.mulf %1, %33 : vector<16x128xf32>
    %cst_12 = arith.constant 1.000000e+00 : f32
    %35 = vector.broadcast %cst_12 : f32 to vector<16x128xf32>
    %36 = arith.subf %35, %1 : vector<16x128xf32>
    %cst_13 = arith.constant 7.500000e-01 : f32
    %37 = vector.broadcast %cst_13 : f32 to vector<16x128xf32>
    %38 = arith.mulf %36, %37 : vector<16x128xf32>
    %39 = arith.addf %34, %38 : vector<16x128xf32>
    %40 = arith.mulf %32, %39 : vector<16x128xf32>
    %41 = vector.shape_cast %40 : vector<16x128xf32> to vector<1x16x128xf32>
    %cst_14 = arith.constant dense<0.000000e+00> : vector<1xf32>
    %42 = vector.multi_reduction <add>, %41, %cst_14 [1, 2] : vector<1x16x128xf32> to vector<1xf32>
    %43 = vector.shape_cast %42 : vector<1xf32> to vector<1x1x1xf32>
    %44 = vector.extract %43[0, 0, 0] : f32 from vector<1x1x1xf32>
    %c0_15 = arith.constant 0 : index
    %c0_16 = arith.constant 0 : index
    %45 = memref.load %arg3[%c0_15, %c0_16] : memref<1x1xf32, #tpu.memory_space<smem>>
    memref.store %44, %arg3[%c0_15, %c0_16] : memref<1x1xf32, #tpu.memory_space<smem>>
    return
  }
  func.func @transform_0(%arg0: i32) -> (i32, i32) {
    %c0_i32 = arith.constant 0 : i32
    %c0_i32_0 = arith.constant 0 : i32
    return %arg0, %c0_i32 : i32, i32
  }
  func.func @transform_1(%arg0: i32) -> (i32, i32) {
    %c0_i32 = arith.constant 0 : i32
    %c0_i32_0 = arith.constant 0 : i32
    return %arg0, %c0_i32 : i32, i32
  }
  func.func @transform_2(%arg0: i32) -> (i32, i32) {
    %c0_i32 = arith.constant 0 : i32
    %c0_i32_0 = arith.constant 0 : i32
    return %arg0, %c0_i32 : i32, i32
  }
}

</mosaic_0001>

<bundles_post_ra>
// kernel: tpu_custom_call.1
= control target key start
LH: loop header
LB: loop body
LE: loop exit
PB: predicated region body
PF: predicated region fallthrough
CT: control target
= control target key end

     0   :  { %7 = vsyncpa [#allocation3], 0  ;;  %s363_s0 = inlined_call_operand.hbm [shape: f32[16,128], index: 0, kind: input, shape index: {}]   ;;  %s364_s1 = inlined_call_operand.hbm [shape: f32[16,128], index: 1, kind: input, shape index: {}]   ;;  %s365_s2 = inlined_call_operand.hbm [shape: f32[1,1], index: 2, kind: output, shape index: {}]  }
   0x1   :  { %8 = vsyncpa [#allocation6], 0 }
   0x2   :  { %9 = vsyncpa [#allocation4], 0  ;;  %s14_s11 = sshll.u32 %s363_s0, 4  ;;  %s286_s12 = smov [#allocation2]   ;;  %s15_s11 = int_to_ptr.hbm [resolvable:$true] %s14_s11 }
   0x3   :  { %s16_s13 = sshll.u32 %s286_s12, 4  ;;  %s27_s16 = sshll.u32 %s364_s1, 4  ;;  %s17_s13 = int_to_ptr.vmem [resolvable:$true] %s16_s13  ;;  %s28_s16 = int_to_ptr.hbm [resolvable:$true] %s27_s16 }
   0x4   :  { %s287_s17 = smov 128   ;;  %s288_s18 = smov 8  }
   0x5   :  { %22 = dma.hbm_to_vmem [thread:$0]  %s15_s11, 256, %s17_s13, [#allocation3], %s287_s17, %s287_s17, %s288_s18  }
   0x6   :  { %s289_s19 = smov [#allocation5]  }
   0x7   :  { %s29_s20 = sshll.u32 %s289_s19, 4  ;;  %s30_s20 = int_to_ptr.vmem [resolvable:$true] %s29_s20 }
   0x8   :  { %35 = dma.hbm_to_vmem [thread:$0]  %s28_s16, 256, %s30_s20, [#allocation6], %s287_s17, %s287_s17, %s288_s18  }
   0x9   :  { %280 = dma.done.wait [#allocation3], 256  }
   0xa   :  { %281 = vsyncadd [#allocation3], 4294967040 }
   0xb   :  { %282 = dma.done.wait [#allocation6], 256  }
   0xc   :  { %283 = vsyncadd [#allocation6], 4294967040  ;;  %v312_v0 = vld [vmem:[#allocation2] sm:$0xff]  ;;  %v314_v1 = vld [vmem:[#allocation2 + $0x8] sm:$0xff]  ;;  %s185_s21 = sshll.u32 %s365_s2, 4  ;;  %s290_s23 = smov [#allocation7]   ;;  %s186_s21 = int_to_ptr.hbm [resolvable:$true] %s185_s21 }
   0xd   :  { %v48_v2 = vand.u32 2147483647, %v312_v0  ;;  %v49_v3 = vand.u32 2147483647, %v314_v1  ;;  %v324_v28 = vld [vmem:[#allocation5] sm:$0xff]  ;;  %v326_v30 = vld [vmem:[#allocation5 + $0x8] sm:$0xff] }
   0xe   :  { %vm114_vm8 = vcmp.ge.f32.partialorder %v312_v0, 0.0  ;;  %vm115_vm9 = vcmp.ge.f32.partialorder %v314_v1, 0.0  ;;  %v122_v36 = vsub.f32 1.0, %v324_v28  ;;  %v123_v38 = vsub.f32 1.0, %v326_v30 }
   0xf   :  { %v50_v4 = vsub.f32 0.0, %v48_v2  ;;  %v51_v5 = vsub.f32 0.0, %v49_v3  ;;  %v56_v62 = vmax.f32 %v312_v0, 0.0  ;;  %v58_v63 = vmul.f32 %v324_v28, %v312_v0 }
  0x10   :  { %v57_v3 = vmax.f32 %v314_v1, 0.0 }
  0x11   :  { %v52_v6 = vmul.f32 1.442695, %v50_v4  ;;  %v54_v7 = vmul.f32 1.442695, %v51_v5  ;;  %v59_v4 = vmul.f32 %v326_v30, %v314_v1 }
  0x13   :  { %204 = vpow2.f32 %v52_v6  ;;  %v61_v1 = vsub.f32 %v57_v3, %v59_v4 }
  0x14   :  { %206 = vpow2.f32 %v54_v7 }
  0x19   :  { %v318_v8 = vpop.eup %204 }
  0x1a   :  { %v320_v9 = vpop.eup %206  ;;  %v62_v10 = vadd.f32 1.0, %v318_v8  ;;  %v65_v50 = vmul.f32 -0.5, %v318_v8  ;;  %v68_v59 = vand.u32 2147483647, %v318_v8 }
  0x1b   :  { %v71_v11 = vadd.f32 1.0, %v320_v9  ;;  %v74_v51 = vmul.f32 -0.5, %v320_v9  ;;  %v77_v60 = vand.u32 2147483647, %v320_v9 }
  0x1c   :  { %208 = vrcp.f32 %v62_v10  ;;  %vm89_vm0 = vweird.f32 %v62_v10  ;;  %v95_v15 = vand.u32 2147483648, %v62_v10  ;;  %v93_v18 = vand.u32 2147483647, %v62_v10 }
  0x1d   :  { %210 = vrcp.f32 %v71_v11  ;;  %v110_v19 = vand.u32 2147483648, %v71_v11  ;;  %vm104_vm2 = vweird.f32 %v71_v11  ;;  %v108_v21 = vand.u32 2147483647, %v71_v11 }
  0x1e   :  { %v96_v23 = vor.u32 1.1754944e-38, %v95_v15  ;;  %vm94_vm5 = vcmp.eq.f32.partialorder %v93_v18, 8.507059e+37  ;;  %212 = vlog2.f32 %v62_v10  ;;  %v66_v54 = vadd.f32 1.0, %v65_v50 }
  0x1f   :  { %v111_v26 = vor.u32 1.1754944e-38, %v110_v19  ;;  %vm109_vm7 = vcmp.eq.f32.partialorder %v108_v21, 8.507059e+37  ;;  %v75_v56 = vadd.f32 1.0, %v74_v51  ;;  %vm346_vm10 = vcmp.lt.f32.partialorder %v68_v59, 0.0004427343 }
  0x20   :  { %v67_v5 = vmul.f32 %v318_v8, %v66_v54  ;;  %vm350_vm11 = vcmp.lt.f32.partialorder %v77_v60, 0.0004427343  ;;  %v160_v19 = vmul.f32 0.25, %v324_v28 }
  0x22   :  { %v209_v12 = vpop.eup %208 }
  0x23   :  { %v211_v13 = vpop.eup %210  ;;  %v85_v14 = vmul.f32 %v209_v12, %v62_v10  ;;  %vm90_vm1 = vweird.f32 %v209_v12 }
  0x24   :  { %v100_v16 = vmul.f32 %v211_v13, %v71_v11  ;;  %vm105_vm3 = vweird.f32 %v211_v13  ;;  %vm91_vm4 = vmor %vm89_vm0, %vm90_vm1  ;;  %v213_v52 = vpop.eup %212 }
  0x25   :  { %v86_v17 = vsub.f32 1.0, %v85_v14  ;;  %vm106_vm6 = vmor %vm104_vm2, %vm105_vm3  ;;  %v64_v7 = vmul.f32 0.6931472, %v213_v52 }
  0x26   :  { %v101_v20 = vsub.f32 1.0, %v100_v16  ;;  %v60_v16 = vsub.f32 %v56_v62, %v58_v63 }
  0x27   :  { %v87_v22 = vmul.f32 %v209_v12, %v86_v17  ;;  %v70_v8 = vsel %vm346_vm10, %v67_v5, %v64_v7 }
  0x28   :  { %v102_v24 = vmul.f32 %v211_v13, %v101_v20 }
  0x29   :  { %v88_v25 = vadd.f32 %v209_v12, %v87_v22  ;;  %v162_v22 = vmul.f32 0.75, %v122_v36 }
  0x2a   :  { %v103_v27 = vadd.f32 %v211_v13, %v102_v24 }
  0x2b   :  { %v92_v29 = vsel %vm91_vm4, %v209_v12, %v88_v25 }
  0x2c   :  { %v97_v31 = vsel %vm94_vm5, %v96_v23, %v92_v29  ;;  %v107_v32 = vsel %vm106_vm6, %v211_v13, %v103_v27  ;;  %v163_v27 = vmul.f32 0.75, %v123_v38  ;;  %v80_v29 = vadd.f32 %v70_v8, %v60_v16 }
  0x2d   :  { %v112_v33 = vsel %vm109_vm7, %v111_v26, %v107_v32  ;;  %v116_v34 = vsub.f32 1.0, %v97_v31  ;;  %v161_v26 = vmul.f32 0.25, %v326_v30 }
  0x2e   :  { %v117_v35 = vsub.f32 1.0, %v112_v33 }
  0x2f   :  { %v118_v37 = vsel %vm114_vm8, %v97_v31, %v116_v34 }
  0x30   :  { %v119_v39 = vsel %vm115_vm9, %v112_v33, %v117_v35  ;;  %v120_v40 = vmul.f32 %v118_v37, %v324_v28  ;;  %v124_v41 = vsub.f32 1.0, %v118_v37  ;;  %v164_v37 = vadd.f32 %v162_v22, %v160_v19 }
  0x31   :  { %v121_v42 = vmul.f32 %v119_v39, %v326_v30  ;;  %v125_v43 = vsub.f32 1.0, %v119_v39 }
  0x32   :  { %v126_v44 = vmul.f32 %v124_v41, %v122_v36 }
  0x33   :  { %v127_v45 = vmul.f32 %v125_v43, %v123_v38 }
  0x34   :  { %v128_v46 = vadd.f32 %v126_v44, %v120_v40  ;;  %v165_v40 = vadd.f32 %v163_v27, %v161_v26 }
  0x35   :  { %v129_v47 = vadd.f32 %v127_v45, %v121_v42 }
  0x36   :  { %v130_v48 = vsub.f32 1.0, %v128_v46 }
  0x37   :  { %v131_v49 = vsub.f32 1.0, %v129_v47 }
  0x38   :  { %214 = vrsqrt.f32 %v130_v48  ;;  %vm139_vm12 = vcmp.eq.f32.partialorder %v130_v48, inf  ;;  %v142_v20 = vand.u32 2147483648, %v130_v48  ;;  %vm141_vm13 = vcmp.eq.f32.partialorder %v130_v48, 0.0 }
  0x39   :  { %216 = vrsqrt.f32 %v131_v49  ;;  %vm151_vm14 = vcmp.eq.f32.partialorder %v131_v49, inf  ;;  %v154_v24 = vand.u32 2147483648, %v131_v49  ;;  %vm153_vm15 = vcmp.eq.f32.partialorder %v131_v49, 0.0 }
  0x3a   :  { %218 = vlog2.f32 %v71_v11  ;;  %v76_v11 = vmul.f32 %v320_v9, %v75_v56 }
  0x3e   :  { %v215_v53 = vpop.eup %214 }
  0x3f   :  { %v217_v55 = vpop.eup %216  ;;  %v133_v57 = vmul.f32 %v215_v53, %v130_v48 }
  0x40   :  { %v219_v58 = vpop.eup %218  ;;  %v145_v61 = vmul.f32 %v217_v55, %v131_v49 }
  0x41   :  { %v134_v2 = vmul.f32 %v215_v53, %v133_v57  ;;  %v73_v10 = vmul.f32 0.6931472, %v219_v58 }
  0x42   :  { %v146_v6 = vmul.f32 %v217_v55, %v145_v61 }
  0x43   :  { %v135_v12 = vmul.f32 0.5, %v134_v2  ;;  %v79_v9 = vsel %vm350_vm11, %v76_v11, %v73_v10 }
  0x44   :  { %v147_v14 = vmul.f32 0.5, %v146_v6  ;;  %v81_v32 = vadd.f32 %v79_v9, %v61_v1 }
  0x45   :  { %v136_v15 = vsub.f32 1.5, %v135_v12 }
  0x46   :  { %v148_v17 = vsub.f32 1.5, %v147_v14 }
  0x47   :  { %v137_v18 = vmul.f32 %v215_v53, %v136_v15 }
  0x48   :  { %v149_v21 = vmul.f32 %v217_v55, %v148_v17 }
  0x49   :  { %v138_v23 = vmul.f32 %v137_v18, %v130_v48 }
  0x4a   :  { %v150_v25 = vmul.f32 %v149_v21, %v131_v49 }
  0x4b   :  { %v140_v31 = vsel %vm139_vm12, %v130_v48, %v138_v23 }
  0x4c   :  { %v143_v33 = vsel %vm141_vm13, %v142_v20, %v140_v31  ;;  %v152_v34 = vsel %vm151_vm14, %v131_v49, %v150_v25 }
  0x4d   :  { %v155_v35 = vsel %vm153_vm15, %v154_v24, %v152_v34  ;;  %v156_v28 = vmul.f32 %v143_v33, %v130_v48 }
  0x4e   :  { %v157_v39 = vmul.f32 %v155_v35, %v131_v49 }
  0x4f   :  { %v158_v36 = vmul.f32 %v156_v28, %v80_v29 }
  0x50   :  { %v159_v41 = vmul.f32 %v157_v39, %v81_v32 }
  0x51   :  { %v166_v42 = vmul.f32 %v164_v37, %v158_v36 }
  0x52   :  { %v167_v43 = vmul.f32 %v165_v40, %v159_v41 }
  0x54   :  { %v168_v44 = vadd.f32 %v167_v43, %v166_v42 }
  0x56   :  { %169 = vadd.xlane.f32.xlu0 %v168_v44 }
  0xc9   :  { %v170_v45 = vpop.xlane.xlu0 %169 }
  0xca   :  { %v171_v46 = vrot.slane %v170_v45, 4 }
  0xcc   :  { %v172_v30 = vadd.f32 %v171_v46, %v170_v45 }
  0xce   :  { %v173_v38 = vrot.slane %v172_v30, 2 }
  0xd0   :  { %v174_v47 = vadd.f32 %v173_v38, %v172_v30 }
  0xd2   :  { %v175_v50 = vrot.slane %v174_v47, 1 }
  0xd4   :  { %v176_v51 = vadd.f32 %v175_v50, %v174_v47 }
  0xd6   :  { %197 = vpush %v176_v51 }
 0x107   :  { %s198_s22 = spop %197 }
 0x108   :  { %179 = sst [smem:[#allocation7]] %s198_s22 }
 0x109   :  { %188 = dma.smem_to_hbm %s290_s23, 16, %s186_s21, [#allocation4]  }
 0x10a   :  { %284 = dma.done.wait [#allocation4], 16  }
 0x10b   :  { %285 = vsyncadd [#allocation4], 4294967280 }
 0x10c   :  { %193 = sfence }
 0x10d   :  { %194 = vsyncpa [#allocation3], 1 }
 0x10e   :  { %195 = vsyncpa [#allocation6], 1 }
 0x10f   :  { %196 = vsyncpa [#allocation4], 1 }

</bundles_post_ra>
